<compile_context>
chip_gen: v7x
topology: tpu7x:2x2x1
jax: 0.10.0
libtpu: 0.0.40
codegen_flags: <defaults>
</compile_context>

<pallas_src>
import functools
import math

import jax
import jax.numpy as jnp
from jax import lax
from jax.experimental import pallas as pl
from jax.experimental.pallas import tpu as pltpu

_LANES = 128
_MAX_TILE_ROWS = 8192  # 8192 * 128 * 4 B = 4 MiB per f32 tile (x2 for double buffering)


def _cdiv(a, b):
    return -(-a // b)


def _round_up(a, b):
    return _cdiv(a, b) * b


def _partial_sums_kernel(x_ref, o_ref, sum_acc, ssq_acc, *,
                         rows, tile_rows, k_per_split, ragged):
    k = pl.program_id(2)

    @pl.when(k == 0)
    def _init():
        sum_acc[...] = jnp.zeros_like(sum_acc)
        ssq_acc[...] = jnp.zeros_like(ssq_acc)

    # (tile_rows, 128): reduce the sublane/row axis into per-lane partials
    # (VPU adds); the single cross-lane reduce happens in the XLA epilogue.
    x = x_ref[0].astype(jnp.float32)
    if ragged:
        # Partial / duplicated trailing block: exclude rows past the true row
        # count with a select (NOT a multiply -- OOB block data may be NaN/Inf).
        s = pl.program_id(1)
        row_start = (s * k_per_split + k) * tile_rows
        row_idx = lax.broadcasted_iota(jnp.int32, x.shape, 0)
        x = jnp.where(row_idx < rows - row_start, x, 0.0)
    sum_acc[...] += jnp.sum(x, axis=0, keepdims=True)
    ssq_acc[...] += jnp.sum(x * x, axis=0, keepdims=True)

    @pl.when(k == k_per_split - 1)
    def _finalize():
        o_ref[...] = jnp.concatenate(
            [sum_acc[...], ssq_acc[...]], axis=0).reshape(o_ref.shape)


def mean_plus_std(x):
    """x: (B, ...) -> (B,) with mean(x_b) + std(x_b) (unbiased, ddof=1)."""
    B = x.shape[0]
    n = math.prod(x.shape[1:])

    flat = x.reshape(B, n)

    rows = _cdiv(n, _LANES)
    n128 = rows * _LANES
    if n128 != n:
        # Fallback only when n % 128 != 0: pads at most 127 zeros per sample so
        # the lane-dense view exists (zeros don't perturb sum / sum-of-squares;
        # the true n is used below).  Common conv shapes hit the no-copy path.
        flat = jnp.pad(flat, ((0, 0), (0, n128 - n)))
    x3d = flat.reshape(B, rows, _LANES)

    # Split the reduction over a second "parallel" axis when B == 1 so both
    # TensorCores are used on v7x (harmless on single-TC v5e/v6e).
    n_split = 2 if (B == 1 and rows >= 16) else 1
    split_rows = _cdiv(rows, n_split)
    num_k = _cdiv(split_rows, _MAX_TILE_ROWS)
    tile_rows = _cdiv(split_rows, num_k)          # balanced: last tile nearly full
    if tile_rows != rows:
        tile_rows = _round_up(tile_rows, 8)       # (8, 128) block constraint
    k_per_split = _cdiv(split_rows, tile_rows)
    last_block = max(_cdiv(rows, tile_rows) - 1, 0)
    ragged = (n_split * k_per_split * tile_rows) != rows

    def in_index_map(b, s, k):
        blk = s * k_per_split + k
        if n_split * k_per_split > last_block + 1:   # compile-time guard
            blk = jnp.minimum(blk, last_block)       # never issue a fully-OOB DMA
        return (b, blk, 0)

    kernel = functools.partial(
        _partial_sums_kernel, rows=rows, tile_rows=tile_rows,
        k_per_split=k_per_split, ragged=ragged)

    parts = pl.pallas_call(
        kernel,
        out_shape=jax.ShapeDtypeStruct((B, n_split, 2, _LANES), jnp.float32),
        grid_spec=pltpu.PrefetchScalarGridSpec(
            num_scalar_prefetch=0,
            grid=(B, n_split, k_per_split),
            in_specs=[pl.BlockSpec((1, tile_rows, _LANES), in_index_map)],
            out_specs=pl.BlockSpec((1, 1, 2, _LANES),
                                   lambda b, s, k: (b, s, 0, 0)),
            scratch_shapes=[
                pltpu.VMEM((1, _LANES), jnp.float32),
                pltpu.VMEM((1, _LANES), jnp.float32),
            ],
        ),
        compiler_params=pltpu.CompilerParams(
            dimension_semantics=("parallel", "parallel", "arbitrary"),
            vmem_limit_bytes=32 * 1024 * 1024,
        ),
    )(x3d)

    # Tiny XLA epilogue: combine lane/split partials into mean + unbiased std.
    s = jnp.sum(parts[:, :, 0, :], axis=(1, 2))
    q = jnp.sum(parts[:, :, 1, :], axis=(1, 2))
    inv_n = 1.0 / n
    # torch.std of a single element is NaN (ddof=1) -- intentionally preserved.
    inv_nm1 = 1.0 / (n - 1) if n > 1 else float("nan")
    mean = s * inv_n
    # One-pass f32 formula; can lose accuracy when |mean| >> std at huge n.
    var = jnp.maximum((q - s * s * inv_n) * inv_nm1, 0.0)
    return (mean + jnp.sqrt(var)).astype(x.dtype)


mean_plus_std_jit = jax.jit(mean_plus_std)


def forward(x):
    """Mirror of PtModule.forward: Python list of per-sample scalars."""
    return list(mean_plus_std_jit(x))


if __name__ == "__main__":
    key = jax.random.PRNGKey(0)

    def _ref(xi):
        xi = xi.astype(jnp.float32)
        return jnp.mean(xi) + jnp.std(xi, ddof=1)

    # Primary case implied by the module: B=2, C=4, H=W=16 (n = 1024 = 8*128).
    x = jax.random.normal(key, (2, 4, 16, 16), dtype=jnp.float32)
    out = jax.block_until_ready(mean_plus_std_jit(x))
    result = list(out)
    for i in range(x.shape[0]):
        ref = _ref(x[i])
        assert jnp.allclose(result[i], ref, atol=1e-5, rtol=1e-4), (i, result[i], ref)

    # B == 1 exercises the two-way reduction split (both TCs on v7x) and the
    # in-kernel ragged-row mask (rows=20 vs a 16-row tile).
    k1, k2 = jax.random.split(key)
    x1 = jax.random.normal(k1, (1, 10, 16, 16), dtype=jnp.float32)
    o1 = jax.block_until_ready(mean_plus_std_jit(x1))
    assert jnp.allclose(o1[0], _ref(x1[0]), atol=1e-5, rtol=1e-4), (o1[0], _ref(x1[0]))

    # n not a multiple of 128 exercises the (tiny) pad fallback.
    x2 = jax.random.normal(k2, (2, 3, 7, 11), dtype=jnp.float32)
    o2 = jax.block_until_ready(mean_plus_std_jit(x2))
    for i in range(2):
        assert jnp.allclose(o2[i], _ref(x2[i]), atol=1e-5, rtol=1e-4)

    print("KERNEL_OK")
</pallas_src>

<mosaic_0001>
module attributes {stable_mosaic.version = 11 : i64} {
  func.func @_partial_sums_kernel(%arg0: i32, %arg1: i32, %arg2: i32, %arg3: memref<1x8x128xf32, #tpu.memory_space<vmem>>, %arg4: memref<1x1x2x128xf32, #tpu.memory_space<vmem>>, %arg5: memref<1x128xf32, #tpu.memory_space<vmem>>, %arg6: memref<1x128xf32, #tpu.memory_space<vmem>>) attributes {dimension_semantics = [#tpu.dimension_semantics<parallel>, #tpu.dimension_semantics<parallel>, #tpu.dimension_semantics<arbitrary>], iteration_bounds = array<i64: 2, 1, 1>, scalar_prefetch = 0 : i64, scratch_operands = 2 : i64, tpu.core_type = #tpu.core_type<tc>, window_params = [{transform_indices = @transform_0, window_bounds = array<i64: 1, 8, 128>}, {transform_indices = @transform_1, window_bounds = array<i64: 1, 1, 2, 128>}]} {
    %c0_i32 = arith.constant 0 : i32
    %0 = arith.cmpi eq, %arg2, %c0_i32 : i32
    %1 = arith.extui %0 : i1 to i32
    %c0_i32_0 = arith.constant 0 : i32
    %2 = arith.cmpi ne, %1, %c0_i32_0 : i32
    scf.if %2 {
      %cst_14 = arith.constant 0.000000e+00 : f32
      %19 = vector.broadcast %cst_14 : f32 to vector<1x128xf32>
      %c0_15 = arith.constant 0 : index
      %c0_16 = arith.constant 0 : index
      %20 = vector.load %arg5[%c0_15, %c0_16] : memref<1x128xf32, #tpu.memory_space<vmem>>, vector<1x128xf32>
      tpu.vector_store %arg5[%c0_15, %c0_16], %19 {strides = array<i32>} : memref<1x128xf32, #tpu.memory_space<vmem>>, vector<1x128xf32>,
      %cst_17 = arith.constant 0.000000e+00 : f32
      %21 = vector.broadcast %cst_17 : f32 to vector<1x128xf32>
      %c0_18 = arith.constant 0 : index
      %c0_19 = arith.constant 0 : index
      %22 = vector.load %arg6[%c0_18, %c0_19] : memref<1x128xf32, #tpu.memory_space<vmem>>, vector<1x128xf32>
      tpu.vector_store %arg6[%c0_18, %c0_19], %21 {strides = array<i32>} : memref<1x128xf32, #tpu.memory_space<vmem>>, vector<1x128xf32>,
    } else {
    }
    %c0 = arith.constant 0 : index
    %c0_1 = arith.constant 0 : index
    %c0_2 = arith.constant 0 : index
    %3 = vector.load %arg3[%c0, %c0_1, %c0_2] : memref<1x8x128xf32, #tpu.memory_space<vmem>>, vector<1x8x128xf32>
    %4 = vector.shape_cast %3 : vector<1x8x128xf32> to vector<8x128xf32>
    %c0_3 = arith.constant 0 : index
    %c0_4 = arith.constant 0 : index
    %5 = vector.load %arg5[%c0_3, %c0_4] : memref<1x128xf32, #tpu.memory_space<vmem>>, vector<1x128xf32>
    %cst = arith.constant dense<0.000000e+00> : vector<128xf32>
    %6 = vector.multi_reduction <add>, %4, %cst [0] : vector<8x128xf32> to vector<128xf32>
    %7 = vector.shape_cast %6 : vector<128xf32> to vector<1x128xf32>
    %8 = arith.addf %5, %7 : vector<1x128xf32>
    %c0_5 = arith.constant 0 : index
    %c0_6 = arith.constant 0 : index
    %9 = vector.load %arg5[%c0_5, %c0_6] : memref<1x128xf32, #tpu.memory_space<vmem>>, vector<1x128xf32>
    tpu.vector_store %arg5[%c0_5, %c0_6], %8 {strides = array<i32>} : memref<1x128xf32, #tpu.memory_space<vmem>>, vector<1x128xf32>,
    %c0_7 = arith.constant 0 : index
    %c0_8 = arith.constant 0 : index
    %10 = vector.load %arg6[%c0_7, %c0_8] : memref<1x128xf32, #tpu.memory_space<vmem>>, vector<1x128xf32>
    %11 = arith.mulf %4, %4 : vector<8x128xf32>
    %cst_9 = arith.constant dense<0.000000e+00> : vector<128xf32>
    %12 = vector.multi_reduction <add>, %11, %cst_9 [0] : vector<8x128xf32> to vector<128xf32>
    %13 = vector.shape_cast %12 : vector<128xf32> to vector<1x128xf32>
    %14 = arith.addf %10, %13 : vector<1x128xf32>
    %c0_10 = arith.constant 0 : index
    %c0_11 = arith.constant 0 : index
    %15 = vector.load %arg6[%c0_10, %c0_11] : memref<1x128xf32, #tpu.memory_space<vmem>>, vector<1x128xf32>
    tpu.vector_store %arg6[%c0_10, %c0_11], %14 {strides = array<i32>} : memref<1x128xf32, #tpu.memory_space<vmem>>, vector<1x128xf32>,
    %c0_i32_12 = arith.constant 0 : i32
    %16 = arith.cmpi eq, %arg2, %c0_i32_12 : i32
    %17 = arith.extui %16 : i1 to i32
    %c0_i32_13 = arith.constant 0 : i32
    %18 = arith.cmpi ne, %17, %c0_i32_13 : i32
    scf.if %18 {
      %c0_14 = arith.constant 0 : index
      %c0_15 = arith.constant 0 : index
      %19 = vector.load %arg5[%c0_14, %c0_15] : memref<1x128xf32, #tpu.memory_space<vmem>>, vector<1x128xf32>
      %c0_16 = arith.constant 0 : index
      %c0_17 = arith.constant 0 : index
      %20 = vector.load %arg6[%c0_16, %c0_17] : memref<1x128xf32, #tpu.memory_space<vmem>>, vector<1x128xf32>
      %21 = tpu.concatenate %19, %20 in 0 : vector<1x128xf32>, vector<1x128xf32> -> vector<2x128xf32>
      %22 = vector.shape_cast %21 : vector<2x128xf32> to vector<1x1x2x128xf32>
      %c0_18 = arith.constant 0 : index
      %c0_19 = arith.constant 0 : index
      %c0_20 = arith.constant 0 : index
      %c0_21 = arith.constant 0 : index
      %23 = vector.load %arg4[%c0_18, %c0_19, %c0_20, %c0_21] : memref<1x1x2x128xf32, #tpu.memory_space<vmem>>, vector<1x1x2x128xf32>
      tpu.vector_store %arg4[%c0_18, %c0_19, %c0_20, %c0_21], %22 {strides = array<i32>} : memref<1x1x2x128xf32, #tpu.memory_space<vmem>>, vector<1x1x2x128xf32>,
    } else {
    }
    return
  }
  func.func @transform_0(%arg0: i32, %arg1: i32, %arg2: i32) -> (i32, i32, i32) {
    %c1_i32 = arith.constant 1 : i32
    %0 = arith.muli %arg1, %c1_i32 : i32
    %1 = arith.addi %0, %arg2 : i32
    %c0_i32 = arith.constant 0 : i32
    %c0_i32_0 = arith.constant 0 : i32
    return %arg0, %1, %c0_i32 : i32, i32, i32
  }
  func.func @transform_1(%arg0: i32, %arg1: i32, %arg2: i32) -> (i32, i32, i32, i32) {
    %c0_i32 = arith.constant 0 : i32
    %c0_i32_0 = arith.constant 0 : i32
    %c0_i32_1 = arith.constant 0 : i32
    return %arg0, %arg1, %c0_i32, %c0_i32_0 : i32, i32, i32, i32
  }
}

</mosaic_0001>

<bundles_post_ra>
// kernel: mean_plus_std.1
= control target key start
LH: loop header
LB: loop body
LE: loop exit
PB: predicated region body
PF: predicated region fallthrough
CT: control target
= control target key end

     0   :  { %s344_s6 = smov 0   ;;  %s346_s7 = smov 0   ;;  %s377_s0 = inlined_call_operand.vmem [shape: f32[2,8,128], index: 0, kind: input, shape index: {}]   ;;  %s378_s1 = inlined_call_operand.vmem [shape: f32[2,1,2,128], index: 1, kind: output, shape index: {}]  }
   0x1   :  { %s348_s8 = smov 0  }
   0x2 LB: > { %s30_s9 = sadd.s32 1, %s327_s7  ;;  %p278_p0 = scmp.ge.s32.totalorder %s331_s8, 1  ;;  %s331_s8 = sphi %s348_s8, %s11_s8   ;;  %s327_s7 = sphi %s346_s7, %s380_s7   ;;  %s323_s6 = sphi %s344_s6, %s379_s6  }
   0x3   : > { %p32_p1 = scmp.ge.s32.totalorder %s30_s9, 2  ;;  %p116_p2 = scmp.lt.s32.totalorder %s331_s8, 3 }
   0x5   : > { %s382_s9 = smov (%p32_p1, %s30_s9), 0  ;;  %p117_p3 = pnand %p278_p0, %p116_p2 }
   0x6   : > { %p142_p4 = scmp.lt.s32.totalorder (!%p117_p3), %s323_s6, 1  ;;  %v333_v0 = vmov (!%p117_p3), 0.0   ;;  %vm194_vm0 = vcmask (!%p117_p3), 1040384  }
   0x7   : > { %120 = sbr.rel (%p117_p3) target bundleno = 44 (0x2c), region = 24  ;;  %161 = vst [vmem:[#allocation2] sm:$0x1] (!%p117_p3), %v333_v0  ;;  %162 = vst [vmem:[#allocation3] sm:$0x1] (!%p117_p3), %v333_v0 }
   0xe   : > { %s384_s6 = smov (!%p142_p4, %s323_s6), 1  ;;  %v164_v12 = vld [vmem:[#allocation2] sm:$0x1]  ;;  %v173_v15 = vld [vmem:[#allocation3] sm:$0x1] }
   0xf   : > { %s279_s10 = sshll.u32 %s384_s6, 3  ;;  %s280_s14 = sshll.u32 %s384_s6, 1 }
  0x10   : > { %s148_s13 = scalar_lea.vmem %s377_s0, %s279_s10  ;;  %s156_s17 = scalar_lea.vmem %s378_s1, %s280_s14 }
  0x11   : > { %v163_v1 = vld [vmem:[%s148_s13] sm:$0xff] }
  0x12   : > { %v165_v2 = vrot.slane %v163_v1, 4  ;;  %v174_v3 = vmul.f32 %v163_v1, %v163_v1 }
  0x14   : > { %v166_v4 = vadd.f32 %v165_v2, %v163_v1  ;;  %v175_v5 = vrot.slane %v174_v3, 4 }
  0x16   : > { %v167_v6 = vrot.slane %v166_v4, 2  ;;  %v176_v7 = vadd.f32 %v175_v5, %v174_v3 }
  0x18   : > { %v168_v8 = vadd.f32 %v167_v6, %v166_v4  ;;  %v177_v9 = vrot.slane %v176_v7, 2 }
  0x1a   : > { %v169_v10 = vrot.slane %v168_v8, 1  ;;  %v178_v11 = vadd.f32 %v177_v9, %v176_v7 }
  0x1c   : > { %v170_v13 = vadd.f32 %v169_v10, %v168_v8  ;;  %v179_v14 = vrot.slane %v178_v11, 1 }
  0x1e   : > { %v171_v16 = vadd.f32 %v170_v13, %v164_v12  ;;  %v180_v17 = vadd.f32 %v179_v14, %v178_v11 }
  0x20   : > { %172 = vst [vmem:[#allocation2] sm:$0x1] %v171_v16  ;;  %v181_v18 = vadd.f32 %v180_v17, %v173_v15 }
  0x22   : > { %182 = vst [vmem:[#allocation3] sm:$0x1] %v181_v18 }
  0x27   : > { %v186_v19 = vld [vmem:[#allocation2] sm:$0x1] }
  0x29   : > { %v281_v20 = vld [vmem:[#allocation3] ss:$0 sm:$0xff] }
  0x2a   : > { %v195_v21 = vsel %vm194_vm0, %v186_v19, %v281_v20 }
  0x2b   : > { %196 = vst [vmem:[%s156_s17] sm:$0x3] %v195_v21 }
  0x2c PF: > { %s11_s8 = sadd.s32 1, %s331_s8   ;;  %s379_s6 = smov %s327_s7 }
  0x2d   : > { %p8_p5 = scmp.ge.s32.totalorder %s11_s8, 4   ;;  %s380_s7 = smov %s382_s9 }
  0x2f   :  { %10 = sbr.rel (!%p8_p5) target bundleno = 2 (0x2), region = 62 }

</bundles_post_ra>
